<compile_context>
chip_gen: v7x
topology: tpu7x:2x2x1
jax: 0.10.0
libtpu: 0.0.40
codegen_flags: <defaults>
</compile_context>

<pallas_src>
import math
from functools import partial

import jax
import jax.numpy as jnp
from jax import lax
from jax.experimental import pallas as pl
from jax.experimental.pallas import tpu as pltpu


# -----------------------------------------------------------------------------
# Roll helper: np.roll semantics; XLU pltpu.roll on (8,128)-aligned tiles, else a
# slice+concat fallback (used at the tiny test shapes).
# -----------------------------------------------------------------------------
def _roll(x, shift, axis):
    size = x.shape[axis]
    shift = shift % size
    if shift == 0:
        return x
    if x.shape[-1] % 128 == 0 and x.shape[-2] % 8 == 0:
        return pltpu.roll(x, shift, axis)
    hi = [slice(None)] * x.ndim
    lo = [slice(None)] * x.ndim
    hi[axis] = slice(size - shift, None)
    lo[axis] = slice(0, size - shift)
    return jnp.concatenate([x[tuple(hi)], x[tuple(lo)]], axis=axis)


# -----------------------------------------------------------------------------
# In-kernel relative shift on a resident (T, T) tile.
# Exact replica of the PyTorch pad/reshape/slice trick (Tq == Tk == T):
#   out[i, j] = pos[i, j + T - 1 - i]   if j <= i
#             = 0                       if j == i + 1
#             = pos[i + 1, j - i - 2]   if j >= i + 2
# Masks are passed in precomputed (hoisted) — the per-bit masks are (T,1).
# -----------------------------------------------------------------------------
def _relative_shift_tile(pos, row2, col2, bit_masks):
    T = pos.shape[0]

    def shear(x):
        # right-roll row i by i positions: log2(T) conditional static rolls.
        out = x
        for b, m in enumerate(bit_masks):
            s = (1 << b) % T
            if s:
                out = jnp.where(m, _roll(out, s, 1), out)
        return out

    shear1 = shear(_roll(pos, 1, 1))                    # -> pos[i, j + T - 1 - i]
    shear2 = shear(_roll(_roll(pos, -1, 0), 2, 1))      # -> pos[i + 1, j - i - 2]
    zero = jnp.zeros_like(pos)
    return jnp.where(col2 <= row2, shear1, jnp.where(col2 == row2 + 1, zero, shear2))


# -----------------------------------------------------------------------------
# Kernel 1: fused per-(batch, head) attention.
#   scores (content + positional) -> relative shift -> softmax -> attn @ V
# -----------------------------------------------------------------------------
def _attn_head_kernel(q_ref, k_ref, v_ref, p_ref, u_ref, vb_ref, o_ref, *, scale):
    T, dh = q_ref.shape[2], q_ref.shape[3]

    q = q_ref[0, 0].astype(jnp.float32)          # (T, dh) — elementwise math in f32
    k = k_ref[0, 0]                              # (T, dh) compute dtype (MXU input)
    v = v_ref[0, 0]
    p = p_ref[0, 0]
    u = u_ref[0].astype(jnp.float32)             # (1, dh)
    vb = vb_ref[0].astype(jnp.float32)

    # Fold u/v biases and the 1/sqrt(d_model) scale into the (T, dh) query operands.
    mxu_dt = k.dtype
    qu = ((q + u) * scale).astype(mxu_dt)
    qv = ((q + vb) * scale).astype(mxu_dt)

    dn = (((1,), (1,)), ((), ()))                # contract dh of both operands
    content = lax.dot_general(qu, k, dn, preferred_element_type=jnp.float32)   # (T,T)
    pos_raw = lax.dot_general(qv, p, dn, preferred_element_type=jnp.float32)   # (T,T)

    # Shear/select masks: computed once per grid step (not per shear call).
    rows = lax.broadcasted_iota(jnp.int32, (T, 1), 0)
    row2 = lax.broadcasted_iota(jnp.int32, (T, T), 0)
    col2 = lax.broadcasted_iota(jnp.int32, (T, T), 1)
    nbits = max((T - 1).bit_length(), 1)
    bit_masks = [((rows >> b) & 1) == 1 for b in range(nbits)]

    score = content + _relative_shift_tile(pos_raw, row2, col2, bit_masks)

    # TODO(synk): optional boolean mask (masked_fill -1e9) and attention dropout
    #             (p=0.1) omitted — inference semantics; the example uses mask=None.
    score = score - jnp.max(score, axis=-1, keepdims=True)
    e = jnp.exp(score)
    inv_l = 1.0 / jnp.sum(e, axis=-1, keepdims=True)   # exact; (T,1) -> negligible
    attn = (e * inv_l).astype(v.dtype)

    o_ref[0, 0] = jnp.dot(attn, v, preferred_element_type=jnp.float32).astype(o_ref.dtype)


def _attention(q, k, v, p, u_bias, v_bias, *, d_model, out_dtype):
    B, H, T, dh = q.shape
    blk = pl.BlockSpec((1, 1, T, dh), lambda b, h: (b, h, 0, 0))
    bias = pl.BlockSpec((1, 1, dh), lambda b, h: (h, 0, 0))
    kernel = partial(_attn_head_kernel, scale=1.0 / math.sqrt(d_model))
    # TODO(synk): add a q/kv tile grid axis + online softmax for long T (the resident
    #             (T,T) temporaries must fit one grid step's VMEM).
    return pl.pallas_call(
        kernel,
        grid=(B, H),
        in_specs=[blk, blk, blk, blk, bias, bias],
        out_specs=blk,
        out_shape=jax.ShapeDtypeStruct((B, H, T, dh), out_dtype),
        compiler_params=pltpu.CompilerParams(
            dimension_semantics=("parallel", "parallel"),
            vmem_limit_bytes=64 * 1024 * 1024,
        ),
    )(q, k, v, p, u_bias.reshape(H, 1, dh), v_bias.reshape(H, 1, dh))


# -----------------------------------------------------------------------------
# Kernel 2: tiled dense projection  y = x @ W + b  (M, N parallel; K reduction).
# -----------------------------------------------------------------------------
def _linear_kernel(x_ref, w_ref, b_ref, o_ref, acc_ref):
    @pl.when(pl.program_id(2) == 0)
    def _():
        acc_ref[...] = jnp.zeros_like(acc_ref)

    acc_ref[...] += jnp.dot(x_ref[...], w_ref[...], preferred_element_type=jnp.float32)

    @pl.when(pl.program_id(2) == pl.num_programs(2) - 1)
    def _():
        o_ref[...] = (acc_ref[...] + b_ref[...].astype(jnp.float32)).astype(o_ref.dtype)


def _pick_tile(dim, target):
    # Aligned target tile when it divides evenly, else the full (small) dimension so
    # blocks always satisfy the (8,128)/full-dim rule.
    return target if dim % target == 0 else dim


def _linear(x, w, b, *, out_dtype, tm=256, tn=512, tk=512):
    M, K = x.shape
    N = w.shape[1]
    tm, tn, tk = _pick_tile(M, tm), _pick_tile(N, tn), _pick_tile(K, tk)
    return pl.pallas_call(
        _linear_kernel,
        grid=(M // tm, N // tn, K // tk),               # reduction axis last
        in_specs=[
            pl.BlockSpec((tm, tk), lambda i, j, k: (i, k)),
            pl.BlockSpec((tk, tn), lambda i, j, k: (k, j)),
            pl.BlockSpec((1, tn), lambda i, j, k: (0, j)),
        ],
        out_specs=pl.BlockSpec((tm, tn), lambda i, j, k: (i, j)),
        out_shape=jax.ShapeDtypeStruct((M, N), out_dtype),
        scratch_shapes=[pltpu.VMEM((tm, tn), jnp.float32)],
        compiler_params=pltpu.CompilerParams(
            dimension_semantics=("parallel", "parallel", "arbitrary"),
            vmem_limit_bytes=64 * 1024 * 1024,
        ),
    )(x, w, b)


# -----------------------------------------------------------------------------
# Full forward pass
# -----------------------------------------------------------------------------
def relative_mha_forward(params, query, key, value, pos_embedding, mask=None,
                         compute_dtype=jnp.float32):
    # TODO(synk): optional mask (masked_fill -1e9) and dropout(p=0.1) not implemented.
    assert mask is None, "mask is not supported by this kernel (inference path)"
    B, Tq, D = query.shape
    H = params["num_heads"]
    dh = D // H
    Tk, Tp = key.shape[1], pos_embedding.shape[1]
    assert Tq == Tk == Tp, "closed-form in-kernel relative shift assumes Tq == Tk == Tp"
    cd = compute_dtype

    def lin(x, w, b):
        t = x.shape[1]
        return _linear(x.reshape(B * t, D).astype(cd), w.astype(cd), b, out_dtype=cd)

    if query is key and key is value:
        # Fused QKV projection: one pass over the activations, one kernel launch.
        w_qkv = jnp.concatenate([params["wq"], params["wk"], params["wv"]], axis=1)
        b_qkv = jnp.concatenate([params["bq"], params["bk"], params["bv"]], axis=1)
        qkv = lin(query, w_qkv, b_qkv)
        q_, k_, v_ = qkv[:, :D], qkv[:, D:2 * D], qkv[:, 2 * D:]
    else:
        q_ = lin(query, params["wq"], params["bq"])
        k_ = lin(key, params["wk"], params["bk"])
        v_ = lin(value, params["wv"], params["bv"])
    p_ = lin(pos_embedding, params["wp"], params["bp_zero"])    # pos_proj: no bias

    # Head-major repack so each grid step's (T, dh) tile is contiguous and lane-dense.
    def to_heads(x, t):
        return x.reshape(B, t, H, dh).transpose(0, 2, 1, 3)

    ctx = _attention(to_heads(q_, Tq), to_heads(k_, Tk), to_heads(v_, Tk),
                     to_heads(p_, Tp), params["u_bias"], params["v_bias"],
                     d_model=D, out_dtype=cd)                    # (B, H, T, dh)
    ctx = ctx.transpose(0, 2, 1, 3).reshape(B * Tq, D)           # rows=(b,t) cols=(h,d)

    out = _linear(ctx.astype(cd), params["wo"].astype(cd), params["bo"],
                  out_dtype=jnp.float32)
    return out.reshape(B, Tq, D)


# -----------------------------------------------------------------------------
# Deterministic synthetic parameters (shapes from the PyTorch __init__)
# -----------------------------------------------------------------------------
def init_params(key, d_model=32, num_heads=4):
    dh = d_model // num_heads
    ks = jax.random.split(key, 11)
    lb = 1.0 / math.sqrt(d_model)               # nn.Linear-style bound

    def lin_w(k):
        return jax.random.uniform(k, (d_model, d_model), jnp.float32, -lb, lb)

    def lin_b(k):
        return jax.random.uniform(k, (1, d_model), jnp.float32, -lb, lb)

    xav = math.sqrt(6.0 / (num_heads + dh))     # xavier_uniform for u/v bias
    return dict(
        num_heads=num_heads,
        d_model=d_model,
        wq=lin_w(ks[0]), bq=lin_b(ks[1]),
        wk=lin_w(ks[2]), bk=lin_b(ks[3]),
        wv=lin_w(ks[4]), bv=lin_b(ks[5]),
        wp=lin_w(ks[6]), bp_zero=jnp.zeros((1, d_model), jnp.float32),
        wo=lin_w(ks[7]), bo=lin_b(ks[8]),
        u_bias=jax.random.uniform(ks[9], (num_heads, dh), jnp.float32, -xav, xav),
        v_bias=jax.random.uniform(ks[10], (num_heads, dh), jnp.float32, -xav, xav),
    )


# -----------------------------------------------------------------------------
# Pure-JAX reference mirroring the PyTorch forward (correctness check)
# -----------------------------------------------------------------------------
def _relative_shift_ref(pos_score):
    B, H, T1, T2 = pos_score.shape
    zeros = jnp.zeros((B, H, T1, 1), pos_score.dtype)
    padded = jnp.concatenate([zeros, pos_score], axis=-1)
    padded = padded.reshape(B, H, T2 + 1, T1)
    return padded[:, :, 1:].reshape(B, H, T1, T2)


def reference_forward(params, query, key, value, pos_embedding):
    B, Tq, D = query.shape
    H = params["num_heads"]
    dh = D // H
    q = (query @ params["wq"] + params["bq"]).reshape(B, -1, H, dh)
    k = (key @ params["wk"] + params["bk"]).reshape(B, -1, H, dh).transpose(0, 2, 1, 3)
    v = (value @ params["wv"] + params["bv"]).reshape(B, -1, H, dh).transpose(0, 2, 1, 3)
    p = (pos_embedding @ params["wp"]).reshape(B, -1, H, dh)

    content = jnp.matmul((q + params["u_bias"]).transpose(0, 2, 1, 3),
                         k.transpose(0, 1, 3, 2))
    pos_score = jnp.matmul((q + params["v_bias"]).transpose(0, 2, 1, 3),
                           p.transpose(0, 2, 3, 1))
    pos_score = _relative_shift_ref(pos_score)
    score = (content + pos_score) / math.sqrt(D)
    attn = jax.nn.softmax(score, axis=-1)
    ctx = jnp.matmul(attn, v).transpose(0, 2, 1, 3).reshape(B, Tq, D)
    return ctx @ params["wo"] + params["bo"]


if __name__ == "__main__":
    B, T, D, H = 2, 8, 32, 4   # batch=2, seq=8, d_model=32, heads=4 (d_head=8)
    key0 = jax.random.PRNGKey(0)
    kp, kq, kk, kv, kpe = jax.random.split(key0, 5)
    params = init_params(kp, d_model=D, num_heads=H)

    query = jax.random.normal(kq, (B, T, D), jnp.float32)
    key_in = jax.random.normal(kk, (B, T, D), jnp.float32)
    value = jax.random.normal(kv, (B, T, D), jnp.float32)
    pos_emb = jax.random.normal(kpe, (B, T, D), jnp.float32)

    # f32 path, cross-attention inputs (strict check vs. PyTorch-equivalent reference).
    ref = reference_forward(params, query, key_in, value, pos_emb)
    out = jax.block_until_ready(relative_mha_forward(params, query, key_in, value, pos_emb))
    assert out.shape == (B, T, D)
    err = float(jnp.max(jnp.abs(out - ref)))
    assert err < 1e-2, f"f32 max abs err {err}"

    # Self-attention (query is key is value) exercises the fused QKV projection path.
    ref_sa = reference_forward(params, query, query, query, pos_emb)
    out_sa = jax.block_until_ready(relative_mha_forward(params, query, query, query, pos_emb))
    err_sa = float(jnp.max(jnp.abs(out_sa - ref_sa)))
    assert err_sa < 1e-2, f"fused-QKV max abs err {err_sa}"

    # bf16 MXU-input path (recommended on v6e/v7x); f32 accumulation & softmax math.
    out_bf16 = jax.block_until_ready(
        relative_mha_forward(params, query, key_in, value, pos_emb,
                             compute_dtype=jnp.bfloat16))
    assert out_bf16.shape == (B, T, D)
    assert bool(jnp.all(jnp.isfinite(out_bf16.astype(jnp.float32))))
    assert float(jnp.max(jnp.abs(out_bf16.astype(jnp.float32) - ref))) < 0.3

    print("KERNEL_OK")
</pallas_src>

<mosaic_0001>
module attributes {stable_mosaic.version = 11 : i64} {
  func.func @_linear_kernel(%arg0: i32, %arg1: i32, %arg2: i32, %arg3: memref<16x32xf32, #tpu.memory_space<vmem>>, %arg4: memref<32x32xf32, #tpu.memory_space<vmem>>, %arg5: memref<1x32xf32, #tpu.memory_space<vmem>>, %arg6: memref<16x32xf32, #tpu.memory_space<vmem>>, %arg7: memref<16x32xf32, #tpu.memory_space<vmem>>) attributes {dimension_semantics = [#tpu.dimension_semantics<parallel>, #tpu.dimension_semantics<parallel>, #tpu.dimension_semantics<arbitrary>], iteration_bounds = array<i64: 1, 1, 1>, scalar_prefetch = 0 : i64, scratch_operands = 1 : i64, tpu.core_type = #tpu.core_type<tc>, window_params = [{transform_indices = @transform_0, window_bounds = array<i64: 16, 32>}, {transform_indices = @transform_1, window_bounds = array<i64: 32, 32>}, {transform_indices = @transform_2, window_bounds = array<i64: 1, 32>}, {transform_indices = @transform_3, window_bounds = array<i64: 16, 32>}]} {
    %c0_i32 = arith.constant 0 : i32
    %0 = arith.cmpi eq, %arg2, %c0_i32 : i32
    %1 = arith.extui %0 : i1 to i32
    %c0_i32_0 = arith.constant 0 : i32
    %2 = arith.cmpi ne, %1, %c0_i32_0 : i32
    scf.if %2 {
      %cst_10 = arith.constant 0.000000e+00 : f32
      %12 = vector.broadcast %cst_10 : f32 to vector<16x32xf32>
      %c0_11 = arith.constant 0 : index
      %c0_12 = arith.constant 0 : index
      %13 = vector.load %arg7[%c0_11, %c0_12] : memref<16x32xf32, #tpu.memory_space<vmem>>, vector<16x32xf32>
      tpu.vector_store %arg7[%c0_11, %c0_12], %12 {strides = array<i32>} : memref<16x32xf32, #tpu.memory_space<vmem>>, vector<16x32xf32>,
    } else {
    }
    %c0 = arith.constant 0 : index
    %c0_1 = arith.constant 0 : index
    %3 = vector.load %arg7[%c0, %c0_1] : memref<16x32xf32, #tpu.memory_space<vmem>>, vector<16x32xf32>
    %c0_2 = arith.constant 0 : index
    %c0_3 = arith.constant 0 : index
    %4 = vector.load %arg3[%c0_2, %c0_3] : memref<16x32xf32, #tpu.memory_space<vmem>>, vector<16x32xf32>
    %c0_4 = arith.constant 0 : index
    %c0_5 = arith.constant 0 : index
    %5 = vector.load %arg4[%c0_4, %c0_5] : memref<32x32xf32, #tpu.memory_space<vmem>>, vector<32x32xf32>
    %cst = arith.constant dense<0.000000e+00> : vector<16x32xf32>
    %6 = tpu.matmul %4, %5, %cst {dimension_numbers = #tpu.dot_dimension_numbers<[1], [0], [0], [1], [0, 0, 1, 1], [], []>} : vector<16x32xf32>, vector<32x32xf32>, vector<16x32xf32> -> vector<16x32xf32>
    %7 = arith.addf %3, %6 : vector<16x32xf32>
    %c0_6 = arith.constant 0 : index
    %c0_7 = arith.constant 0 : index
    %8 = vector.load %arg7[%c0_6, %c0_7] : memref<16x32xf32, #tpu.memory_space<vmem>>, vector<16x32xf32>
    tpu.vector_store %arg7[%c0_6, %c0_7], %7 {strides = array<i32>} : memref<16x32xf32, #tpu.memory_space<vmem>>, vector<16x32xf32>,
    %c0_i32_8 = arith.constant 0 : i32
    %9 = arith.cmpi eq, %arg2, %c0_i32_8 : i32
    %10 = arith.extui %9 : i1 to i32
    %c0_i32_9 = arith.constant 0 : i32
    %11 = arith.cmpi ne, %10, %c0_i32_9 : i32
    scf.if %11 {
      %c0_10 = arith.constant 0 : index
      %c0_11 = arith.constant 0 : index
      %12 = vector.load %arg7[%c0_10, %c0_11] : memref<16x32xf32, #tpu.memory_space<vmem>>, vector<16x32xf32>
      %c0_12 = arith.constant 0 : index
      %c0_13 = arith.constant 0 : index
      %13 = vector.load %arg5[%c0_12, %c0_13] : memref<1x32xf32, #tpu.memory_space<vmem>>, vector<1x32xf32>
      %14 = vector.broadcast %13 : vector<1x32xf32> to vector<16x32xf32>
      %15 = arith.addf %12, %14 : vector<16x32xf32>
      %c0_14 = arith.constant 0 : index
      %c0_15 = arith.constant 0 : index
      %16 = vector.load %arg6[%c0_14, %c0_15] : memref<16x32xf32, #tpu.memory_space<vmem>>, vector<16x32xf32>
      tpu.vector_store %arg6[%c0_14, %c0_15], %15 {strides = array<i32>} : memref<16x32xf32, #tpu.memory_space<vmem>>, vector<16x32xf32>,
    } else {
    }
    return
  }
  func.func @transform_0(%arg0: i32, %arg1: i32, %arg2: i32) -> (i32, i32) {
    %c0_i32 = arith.constant 0 : i32
    return %arg0, %arg2 : i32, i32
  }
  func.func @transform_1(%arg0: i32, %arg1: i32, %arg2: i32) -> (i32, i32) {
    %c0_i32 = arith.constant 0 : i32
    return %arg2, %arg1 : i32, i32
  }
  func.func @transform_2(%arg0: i32, %arg1: i32, %arg2: i32) -> (i32, i32) {
    %c0_i32 = arith.constant 0 : i32
    %c0_i32_0 = arith.constant 0 : i32
    return %c0_i32, %arg1 : i32, i32
  }
  func.func @transform_3(%arg0: i32, %arg1: i32, %arg2: i32) -> (i32, i32) {
    %c0_i32 = arith.constant 0 : i32
    return %arg0, %arg1 : i32, i32
  }
}

</mosaic_0001>

<bundles_post_ra>
// kernel: tpu_custom_call.1
= control target key start
LH: loop header
LB: loop body
LE: loop exit
PB: predicated region body
PF: predicated region fallthrough
CT: control target
= control target key end

     0   :  { %8 = vsyncpa [#allocation4], 0  ;;  %s417_s0 = inlined_call_operand.hbm [shape: f32[16,32], index: 0, kind: input, shape index: {}]   ;;  %s418_s1 = inlined_call_operand.hbm [shape: f32[32,32], index: 1, kind: input, shape index: {}]   ;;  %s419_s2 = inlined_call_operand.hbm [shape: f32[1,32], index: 2, kind: input, shape index: {}]   ;;  %s420_s3 = inlined_call_operand.hbm [shape: f32[16,32], index: 3, kind: output, shape index: {}]  }
   0x1   :  { %9 = vsyncpa [#allocation7], 0 }
   0x2   :  { %10 = vsyncpa [#allocation5], 0  ;;  %s318_s12 = smov [#allocation6]   ;;  %s319_s14 = smov [#allocation3]  }
   0x3   :  { %s28_s13 = sshll.u32 %s318_s12, 4  ;;  %s16_s15 = sshll.u32 %s319_s14, 4  ;;  %s29_s13 = int_to_ptr.vmem [resolvable:$true] %s28_s13  ;;  %s345_s15 = int_to_ptr.vmem [resolvable:$true] %s16_s15 }
   0x4   :  { %s224_s18 = scalar_lea.hbm %s418_s1, 512 }
   0x5   :  { %p225_p0 = scmp.ne.s32.totalorder %s418_s1, %s224_s18  ;;  %p228_p1 = scmp.lt.u32.totalorder %s224_s18, %s418_s1 }
   0x7   :  { %p230_p2 = pnand %p228_p1, %p225_p0 }
   0x9   :  { %233 = shalt.err (!%p230_p2)
}
   0xa   :  { %s234_s23 = scalar_lea.vmem %s29_s13, 512  ;;  %p239_p4 = scmp.lt.s32.totalorder %s29_s13, %s29_s13 }
   0xb   :  { %p235_p3 = scmp.ne.s32.totalorder %s29_s13, %s234_s23  ;;  %p240_p5 = scmp.lt.s32.totalorder %s234_s23, %s234_s23 }
   0xd   :  { %p241_p6 = por %p240_p5, %p239_p4 }
   0xf   :  { %p242_p7 = pnand %p241_p6, %p235_p3 }
  0x11   :  { %245 = shalt.err (!%p242_p7)
}
  0x12   :  { %s320_s24 = smov 128   ;;  %s321_s25 = smov 8  }
  0x13   :  { %34 = dma.hbm_to_vmem [thread:$0]  %s418_s1, 512, %s29_s13, [#allocation7], %s320_s24, %s320_s24, %s321_s25  }
  0x14   :  { %s246_s30 = scalar_lea.hbm %s417_s0, 256 }
  0x15   :  { %p247_p8 = scmp.ne.s32.totalorder %s417_s0, %s246_s30  ;;  %p250_p9 = scmp.lt.u32.totalorder %s246_s30, %s417_s0 }
  0x17   :  { %p252_p10 = pnand %p250_p9, %p247_p8 }
  0x19   :  { %255 = shalt.err (!%p252_p10)
}
  0x1a   :  { %s256_s8 = scalar_lea.vmem %s345_s15, 256  ;;  %p261_p12 = scmp.lt.s32.totalorder %s345_s15, %s345_s15 }
  0x1b   :  { %p257_p11 = scmp.ne.s32.totalorder %s345_s15, %s256_s8  ;;  %p262_p13 = scmp.lt.s32.totalorder %s256_s8, %s256_s8 }
  0x1d   :  { %p263_p0 = por %p262_p13, %p261_p12 }
  0x1f   :  { %p264_p1 = pnand %p263_p0, %p257_p11 }
  0x21   :  { %267 = shalt.err (!%p264_p1)
}
  0x22   :  { %22 = dma.hbm_to_vmem [thread:$0]  %s417_s0, 256, %s345_s15, [#allocation4], %s320_s24, %s320_s24, %s321_s25  }
  0x23   :  { %s322_s10 = smov [#allocation8]   ;;  %s268_s14 = scalar_lea.hbm %s419_s2, 16 }
  0x24   :  { %s41_s11 = sshll.u32 %s322_s10, 4  ;;  %p269_p2 = scmp.ne.s32.totalorder %s419_s2, %s268_s14  ;;  %s42_s11 = int_to_ptr.vmem [resolvable:$true] %s41_s11 }
  0x25   :  { %p272_p3 = scmp.lt.u32.totalorder %s268_s14, %s419_s2 }
  0x27   :  { %p274_p4 = pnand %p272_p3, %p269_p2 }
  0x29   :  { %277 = shalt.err (!%p274_p4)
}
  0x2a   :  { %s278_s20 = scalar_lea.vmem %s42_s11, 16  ;;  %s282_s0 = scalar_lea.vmem %s42_s11, 32 }
  0x2b   :  { %p279_p5 = scmp.ne.s32.totalorder %s42_s11, %s278_s20  ;;  %p283_p6 = scmp.lt.s32.totalorder %s42_s11, %s42_s11 }
  0x2c   :  { %p284_p7 = scmp.lt.s32.totalorder %s282_s0, %s278_s20 }
  0x2e   :  { %p285_p8 = por %p284_p7, %p283_p6 }
  0x30   :  { %p286_p9 = pnand %p285_p8, %p279_p5 }
  0x32   :  { %289 = shalt.err (!%p286_p9)
}
  0x33   :  { %44 = dma.hbm_to_vmem [thread:$0]  %s419_s2, 16, %s42_s11, [#allocation7]  }
  0x34   :  { %312 = dma.done.wait [#allocation4], 256  }
  0x35   :  { %313 = vsyncadd [#allocation4], 4294967040 }
  0x36   :  { %314 = dma.done.wait [#allocation7], 528  }
  0x37   :  { %315 = vsyncadd [#allocation7], 4294966768  ;;  %vm58_vm0 = vcmask 261120   ;;  %v323_v0 = vmov 0.0   ;;  %v65_v1 = vld [vmem:[#allocation6] sm:$0xff]  ;;  %v66_v2 = vld [vmem:[#allocation6 + $0x8] sm:$0xff] }
  0x38   :  { %60 = vst.msk [vmem:[#allocation2 + $0x8] sm:$0xff] %vm58_vm0, %v323_v0  ;;  %59 = vst.msk [vmem:[#allocation2] sm:$0xff] %vm58_vm0, %v323_v0  ;;  %v67_v3 = vld [vmem:[#allocation6 + $0x10] sm:$0xff]  ;;  %v209_v4 = vpack.c.bf16 %v66_v2, %v65_v1  ;;  %v68_v5 = vld [vmem:[#allocation6 + $0x18] sm:$0xff]  ;;  %s324_s2 = smov [#allocation9]  }
  0x39   :  { %v63_v6 = vld [vmem:[#allocation3] sm:$0xff]  ;;  %v213_v7 = vpack.c.bf16 %v68_v5, %v67_v3  ;;  %v64_v8 = vld [vmem:[#allocation3 + $0x8] sm:$0xff]  ;;  %v191_v15 = vld [vmem:[#allocation8] ss:$0 sm:$0xff]  ;;  %s176_s22 = sshll.u32 %s324_s2, 4  ;;  %s177_s22 = int_to_ptr.vmem [resolvable:$true] %s176_s22 }
  0x3a   :  { %206 = vmatprep.mubr.msk.f32.mxu0 %vm58_vm0, %v63_v6  ;;  %210 = vmatprep.subr.bf16.mxu0 %v209_v4  ;;  %s290_s23 = scalar_lea.vmem %s177_s22, 256  ;;  %p295_p11 = scmp.lt.s32.totalorder %s177_s22, %s177_s22 }
  0x3b   :  { %212 = vmatpush3.bf16.msra.mxu0 %v209_v4  ;;  %p291_p10 = scmp.ne.s32.totalorder %s177_s22, %s290_s23  ;;  %p296_p12 = scmp.lt.s32.totalorder %s290_s23, %s290_s23 }
  0x3c   :  { %214 = vmatprep.subr.bf16.mxu0 %v213_v7 }
  0x3d   :  { %p297_p13 = por %p296_p12, %p295_p11 }
  0x3f   :  { %216 = vmatpush3.bf16.msra.mxu0 %v213_v7  ;;  %v62_v9 = vld [vmem:[#allocation2 + $0x8] sm:$0xff]  ;;  %v61_v10 = vld [vmem:[#allocation2] sm:$0xff]  ;;  %p298_p0 = pnand %p297_p13, %p291_p10 }
  0x42   :  { %207 = vmatmul.mubr.msk.f32.vlgmr.msra.gmra.mrb[0].mxu0 %vm58_vm0, %v64_v8 }
 0x115   :  { %v208_v11 = vpop.f32.mrb[0].mxu0 }
 0x116   :  { %v152_v12 = vadd.f32 %v208_v11, %v62_v9  ;;  %v142_v13 = vpop.f32.mrb[1].mxu0 }
 0x117   :  { %v151_v14 = vadd.f32 %v142_v13, %v61_v10 }
 0x118   :  { %154 = vst.msk [vmem:[#allocation2 + $0x8] sm:$0xff] %vm58_vm0, %v152_v12 }
 0x119   :  { %153 = vst.msk [vmem:[#allocation2] sm:$0xff] %vm58_vm0, %v151_v14 }
 0x11f   :  { %v159_v16 = vld [vmem:[#allocation2 + $0x8] sm:$0xff] }
 0x120   :  { %v158_v17 = vld [vmem:[#allocation2] sm:$0xff]  ;;  %v168_v18 = vadd.f32 %v191_v15, %v159_v16 }
 0x121   :  { %v167_v19 = vadd.f32 %v191_v15, %v158_v17 }
 0x122   :  { %170 = vst.msk [vmem:[#allocation9 + $0x8] sm:$0xff] %vm58_vm0, %v168_v18 }
 0x123   :  { %169 = vst.msk [vmem:[#allocation9] sm:$0xff] %vm58_vm0, %v167_v19 }
 0x124   :  { %301 = shalt.err (!%p298_p0)
}
 0x125   :  { %s302_s28 = scalar_lea.hbm %s420_s3, 256 }
 0x126   :  { %p303_p1 = scmp.ne.s32.totalorder %s420_s3, %s302_s28  ;;  %p306_p2 = scmp.lt.u32.totalorder %s302_s28, %s420_s3 }
 0x128   :  { %p308_p3 = pnand %p306_p2, %p303_p1 }
 0x12a   :  { %311 = shalt.err (!%p308_p3)
}
 0x12b   :  { %182 = dma.vmem_to_hbm [thread:$0]  %s177_s22, 256, %s420_s3, [#allocation5], %s320_s24, %s320_s24, %s321_s25  }
 0x12c   :  { %316 = dma.done.wait [#allocation5], 256  }
 0x12d   :  { %317 = vsyncadd [#allocation5], 4294967040 }
 0x12e   :  { %186 = vsyncpa [#allocation4], 1 }
 0x12f   :  { %187 = vsyncpa [#allocation7], 1 }
 0x130   :  { %188 = vsyncpa [#allocation5], 1 }

</bundles_post_ra>
